<compile_context>
chip_gen: v7x
topology: tpu7x:2x2x1
jax: 0.10.0
libtpu: 0.0.40
codegen_flags: <defaults>
</compile_context>

<pallas_src>
import jax
import jax.numpy as jnp
from jax.experimental import pallas as pl
from jax.experimental.pallas import tpu as pltpu

_LANES = 128


def _default_budget_bytes():
    """Per-x-buffer VMEM budget (Pallas double-buffers inputs -> 2x this)."""
    try:
        info = pltpu.get_tpu_info()
        vmem = getattr(info, "vmem_capacity_bytes", 0) or 0
        if 0 < vmem <= 64 * 1024 * 1024:
            # v7x-class: bigger blocks amortize per-step overhead at 3.2 TB/s;
            # 2 x 8 MiB + small scratch still fits the 32 MiB scoped default.
            return 8 * 1024 * 1024
    except Exception:
        pass
    # v5e/v6e: 4 MiB is at the bandwidth-efficiency knee and 2 x 4 MiB + small
    # scratch fits v5e's 16 MiB scoped-VMEM default.
    return 4 * 1024 * 1024


def _divisors_desc(n):
    return sorted({d for d in range(1, n + 1) if n % d == 0}, reverse=True)


def _pick_tiles(n, c, hw, itemsize, budget):
    """Choose (n_tile, hw_tile): prefer full HW, tile batch; keep >=2 batch steps."""
    def x_bytes(nt, hwt):
        return nt * c * hwt * itemsize

    # hw_tile: full spatial plane when one sample fits the budget (or when HW
    # is not a multiple of 128, where lane-tiling is not legal anyway).
    if hw % _LANES != 0 or x_bytes(1, hw) <= budget:
        hw_tile = hw
    else:
        hw_tile = _LANES
        for t in range(hw, 0, -_LANES):
            if hw % t == 0 and x_bytes(1, t) <= budget:
                hw_tile = t
                break

    # n_tile: largest divisor of N under the budget.  Megacore (v7x): cap at
    # N//2 when N >= 2 so the parallel batch axis always has >= 2 grid steps.
    cands = [d for d in _divisors_desc(n) if n < 2 or d <= n // 2] or [1]
    n_tile = 1
    for d in cands:
        if x_bytes(d, hw_tile) <= budget:
            n_tile = d
            break
    return n_tile, hw_tile


def channel_attention(x, w1_torch, w2_torch, *, budget_bytes=None):
    """x: (N, C, H, W). w1_torch: (C//r, C, 1, 1). w2_torch: (C, C//r, 1, 1).
    Returns sigmoid attention weights of shape (N, C, 1, 1), matching PyTorch."""
    N, C, H, W = x.shape
    Cr = w1_torch.shape[0]
    HW = H * W

    x_flat = x.reshape(N, C, HW)                  # (N, C, HW): HW on the lane axis
    w1 = w1_torch.reshape(Cr, C).T                # (C, Cr)
    w2 = w2_torch.reshape(C, Cr).T                # (Cr, C)

    if budget_bytes is None:
        budget_bytes = _default_budget_bytes()
    n_tile, hw_tile = _pick_tiles(N, C, HW, x.dtype.itemsize, budget_bytes)

    inv_hw = 1.0 / float(HW)
    grid = (N // n_tile, HW // hw_tile)           # reduction (HW) axis last

    # Per-step lane-chunking: bound the f32 working set and the unroll depth;
    # only small (n_tile, C) partials are carried across chunks.
    n_lane_tiles = -(-hw_tile // _LANES)
    n_chunks = min(n_lane_tiles, 8)
    chunk_w = -(-n_lane_tiles // n_chunks) * _LANES

    def kernel(x_ref, w1_ref, w2_ref, o_ref, sum_ref, max_ref):
        k = pl.program_id(1)

        @pl.when(k == 0)
        def _init():
            sum_ref[...] = jnp.zeros_like(sum_ref)
            max_ref[...] = jnp.full_like(max_ref, -jnp.inf)

        # Reduce this (n_tile, C, hw_tile) block over the lane (HW) axis in
        # bounded chunks.  The cross-lane (XLU) reduce is effectively free in
        # this HBM-bound stream; carries are tiny (n_tile, C) f32 values.
        psum = None
        pmax = None
        for start in range(0, hw_tile, chunk_w):
            size = min(chunk_w, hw_tile - start)
            chunk = x_ref[:, :, start:start + size].astype(jnp.float32)
            cs = jnp.sum(chunk, axis=-1)
            cm = jnp.max(chunk, axis=-1)
            psum = cs if psum is None else psum + cs
            pmax = cm if pmax is None else jnp.maximum(pmax, cm)
        sum_ref[...] = sum_ref[...] + psum
        max_ref[...] = jnp.maximum(max_ref[...], pmax)

        @pl.when(k == pl.num_programs(1) - 1)
        def _finalize():
            avg = sum_ref[...] * inv_hw                            # (n_tile, C)
            mx = max_ref[...]                                      # (n_tile, C)
            w1v = w1_ref[...].astype(jnp.float32)                  # (C, Cr)
            w2v = w2_ref[...].astype(jnp.float32)                  # (Cr, C)
            # Fuse the avg/max branches into a single pair of matmuls.
            pooled = jnp.concatenate([avg, mx], axis=0)            # (2*n_tile, C)
            h = jnp.maximum(
                jnp.dot(pooled, w1v, preferred_element_type=jnp.float32), 0.0)
            y = jnp.dot(h, w2v, preferred_element_type=jnp.float32)
            logits = y[:n_tile] + y[n_tile:]
            o_ref[...] = jax.nn.sigmoid(logits)[:, None, :].astype(o_ref.dtype)

    # TODO(synk): if traces on v7x show exposed DMA with a short HW grid, try
    # pipeline_mode=pl.Buffered(3) on the x BlockSpec (trades VMEM for latency).
    out = pl.pallas_call(
        kernel,
        out_shape=jax.ShapeDtypeStruct((N, 1, C), x.dtype),
        grid_spec=pltpu.PrefetchScalarGridSpec(
            num_scalar_prefetch=0,
            grid=grid,
            in_specs=[
                pl.BlockSpec((n_tile, C, hw_tile), lambda n, k: (n, 0, k)),
                pl.BlockSpec((C, Cr), lambda n, k: (0, 0)),   # resident weights
                pl.BlockSpec((Cr, C), lambda n, k: (0, 0)),
            ],
            # (N, 1, C) output: last two dims are full-extent, so any divisor
            # of N is a legal batch tile (no (8,128) constraint on n_tile).
            out_specs=pl.BlockSpec((n_tile, 1, C), lambda n, k: (n, 0, 0)),
            scratch_shapes=[
                pltpu.VMEM((n_tile, C), jnp.float32),   # running sum (C on lanes)
                pltpu.VMEM((n_tile, C), jnp.float32),   # running max
            ],
        ),
        compiler_params=pltpu.CompilerParams(
            dimension_semantics=("parallel", "arbitrary"),
        ),
        cost_estimate=pl.CostEstimate(
            flops=int(2 * N * C * HW + 8 * N * C * Cr),
            transcendentals=int(N * C),
            bytes_accessed=int(N * C * HW * x.dtype.itemsize
                               + 2 * C * Cr * w1.dtype.itemsize
                               + N * C * x.dtype.itemsize),
        ),
    )(x_flat, w1, w2)
    return out.reshape(N, C, 1, 1)


def channel_attention_ref(x, w1_torch, w2_torch):
    """Pure-JAX reference mirroring the PyTorch module."""
    N, C, H, W = x.shape
    Cr = w1_torch.shape[0]
    xf = x.astype(jnp.float32).reshape(N, C, H * W)
    avg = jnp.mean(xf, axis=-1)
    mx = jnp.max(xf, axis=-1)
    w1 = w1_torch.reshape(Cr, C).astype(jnp.float32)
    w2 = w2_torch.reshape(C, Cr).astype(jnp.float32)

    def mlp(v):
        return jnp.maximum(v @ w1.T, 0.0) @ w2.T

    return jax.nn.sigmoid(mlp(avg) + mlp(mx)).reshape(N, C, 1, 1).astype(x.dtype)


if __name__ == "__main__":
    # Small shapes consistent with the module (in_planes >= reduction).
    N, C, H, W = 2, 32, 16, 16
    reduction = 16
    Cr = C // reduction

    key = jax.random.PRNGKey(0)
    kx, k1, k2 = jax.random.split(key, 3)
    x = jax.random.normal(kx, (N, C, H, W), dtype=jnp.float32)
    # PyTorch Conv2d weight shapes (out, in, 1, 1), bias-free.
    w1_torch = jax.random.normal(k1, (Cr, C, 1, 1), dtype=jnp.float32) * 0.1
    w2_torch = jax.random.normal(k2, (C, Cr, 1, 1), dtype=jnp.float32) * 0.1

    ref = channel_attention_ref(x, w1_torch, w2_torch)

    # Tiny forced budget -> hw_tile=128, 2 HW grid steps: exercises the running
    # sum/max accumulator + init/finalize path.
    out = jax.block_until_ready(
        channel_attention(x, w1_torch, w2_torch,
                          budget_bytes=C * 128 * x.dtype.itemsize))
    assert out.shape == (N, C, 1, 1)
    assert jnp.allclose(out, ref, atol=1e-5, rtol=1e-5)

    # Default tiling (full HW per step, batch axis split for megacore).
    out2 = jax.block_until_ready(channel_attention(x, w1_torch, w2_torch))
    assert jnp.allclose(out2, ref, atol=1e-5, rtol=1e-5)

    print("KERNEL_OK")
</pallas_src>

<mosaic_0001>
module attributes {stable_mosaic.version = 11 : i64} {
  func.func @kernel(%arg0: i32, %arg1: i32, %arg2: memref<1x32x128xf32, #tpu.memory_space<vmem>>, %arg3: memref<32x2xf32, #tpu.memory_space<vmem>>, %arg4: memref<2x32xf32, #tpu.memory_space<vmem>>, %arg5: memref<1x1x32xf32, #tpu.memory_space<vmem>>, %arg6: memref<1x32xf32, #tpu.memory_space<vmem>>, %arg7: memref<1x32xf32, #tpu.memory_space<vmem>>) attributes {dimension_semantics = [#tpu.dimension_semantics<parallel>, #tpu.dimension_semantics<arbitrary>], iteration_bounds = array<i64: 2, 2>, scalar_prefetch = 0 : i64, scratch_operands = 2 : i64, tpu.core_type = #tpu.core_type<tc>, window_params = [{transform_indices = @transform_0, window_bounds = array<i64: 1, 32, 128>}, {pipeline_mode = #tpu.pipeline_mode<synchronous>, transform_indices = @transform_1, window_bounds = array<i64: 32, 2>}, {pipeline_mode = #tpu.pipeline_mode<synchronous>, transform_indices = @transform_2, window_bounds = array<i64: 2, 32>}, {transform_indices = @transform_3, window_bounds = array<i64: 1, 1, 32>}]} {
    %c0_i32 = arith.constant 0 : i32
    %0 = arith.cmpi eq, %arg1, %c0_i32 : i32
    %1 = arith.extui %0 : i1 to i32
    %c0_i32_0 = arith.constant 0 : i32
    %2 = arith.cmpi ne, %1, %c0_i32_0 : i32
    scf.if %2 {
      %cst_13 = arith.constant 0.000000e+00 : f32
      %15 = vector.broadcast %cst_13 : f32 to vector<1x32xf32>
      %c0_14 = arith.constant 0 : index
      %c0_15 = arith.constant 0 : index
      %16 = vector.load %arg6[%c0_14, %c0_15] : memref<1x32xf32, #tpu.memory_space<vmem>>, vector<1x32xf32>
      tpu.vector_store %arg6[%c0_14, %c0_15], %15 {strides = array<i32>} : memref<1x32xf32, #tpu.memory_space<vmem>>, vector<1x32xf32>,
      %cst_16 = arith.constant 0xFF800000 : f32
      %17 = vector.broadcast %cst_16 : f32 to vector<1x32xf32>
      %c0_17 = arith.constant 0 : index
      %c0_18 = arith.constant 0 : index
      %18 = vector.load %arg7[%c0_17, %c0_18] : memref<1x32xf32, #tpu.memory_space<vmem>>, vector<1x32xf32>
      tpu.vector_store %arg7[%c0_17, %c0_18], %17 {strides = array<i32>} : memref<1x32xf32, #tpu.memory_space<vmem>>, vector<1x32xf32>,
    } else {
    }
    %c0 = arith.constant 0 : index
    %c0_1 = arith.constant 0 : index
    %c0_2 = arith.constant 0 : index
    %3 = vector.load %arg2[%c0, %c0_1, %c0_2] : memref<1x32x128xf32, #tpu.memory_space<vmem>>, vector<1x32x128xf32>
    %cst = arith.constant dense<0.000000e+00> : vector<1x32xf32>
    %4 = vector.multi_reduction <add>, %3, %cst [2] : vector<1x32x128xf32> to vector<1x32xf32>
    %cst_3 = arith.constant dense<0xFF800000> : vector<1x32xf32>
    %5 = vector.multi_reduction <maximumf>, %3, %cst_3 [2] : vector<1x32x128xf32> to vector<1x32xf32>
    %c0_4 = arith.constant 0 : index
    %c0_5 = arith.constant 0 : index
    %6 = vector.load %arg6[%c0_4, %c0_5] : memref<1x32xf32, #tpu.memory_space<vmem>>, vector<1x32xf32>
    %7 = arith.addf %6, %4 : vector<1x32xf32>
    %c0_6 = arith.constant 0 : index
    %c0_7 = arith.constant 0 : index
    %8 = vector.load %arg6[%c0_6, %c0_7] : memref<1x32xf32, #tpu.memory_space<vmem>>, vector<1x32xf32>
    tpu.vector_store %arg6[%c0_6, %c0_7], %7 {strides = array<i32>} : memref<1x32xf32, #tpu.memory_space<vmem>>, vector<1x32xf32>,
    %c0_8 = arith.constant 0 : index
    %c0_9 = arith.constant 0 : index
    %9 = vector.load %arg7[%c0_8, %c0_9] : memref<1x32xf32, #tpu.memory_space<vmem>>, vector<1x32xf32>
    %10 = arith.maximumf %9, %5 : vector<1x32xf32>
    %c0_10 = arith.constant 0 : index
    %c0_11 = arith.constant 0 : index
    %11 = vector.load %arg7[%c0_10, %c0_11] : memref<1x32xf32, #tpu.memory_space<vmem>>, vector<1x32xf32>
    tpu.vector_store %arg7[%c0_10, %c0_11], %10 {strides = array<i32>} : memref<1x32xf32, #tpu.memory_space<vmem>>, vector<1x32xf32>,
    %c1_i32 = arith.constant 1 : i32
    %12 = arith.cmpi eq, %arg1, %c1_i32 : i32
    %13 = arith.extui %12 : i1 to i32
    %c0_i32_12 = arith.constant 0 : i32
    %14 = arith.cmpi ne, %13, %c0_i32_12 : i32
    scf.if %14 {
      %c0_13 = arith.constant 0 : index
      %c0_14 = arith.constant 0 : index
      %15 = vector.load %arg6[%c0_13, %c0_14] : memref<1x32xf32, #tpu.memory_space<vmem>>, vector<1x32xf32>
      %cst_15 = arith.constant 3.906250e-03 : f32
      %16 = vector.broadcast %cst_15 : f32 to vector<1x32xf32>
      %17 = arith.mulf %15, %16 : vector<1x32xf32>
      %c0_16 = arith.constant 0 : index
      %c0_17 = arith.constant 0 : index
      %18 = vector.load %arg7[%c0_16, %c0_17] : memref<1x32xf32, #tpu.memory_space<vmem>>, vector<1x32xf32>
      %c0_18 = arith.constant 0 : index
      %c0_19 = arith.constant 0 : index
      %19 = vector.load %arg3[%c0_18, %c0_19] : memref<32x2xf32, #tpu.memory_space<vmem>>, vector<32x2xf32>
      %c0_20 = arith.constant 0 : index
      %c0_21 = arith.constant 0 : index
      %20 = vector.load %arg4[%c0_20, %c0_21] : memref<2x32xf32, #tpu.memory_space<vmem>>, vector<2x32xf32>
      %21 = tpu.concatenate %17, %18 in 0 : vector<1x32xf32>, vector<1x32xf32> -> vector<2x32xf32>
      %cst_22 = arith.constant dense<0.000000e+00> : vector<2x2xf32>
      %22 = tpu.matmul %21, %19, %cst_22 {dimension_numbers = #tpu.dot_dimension_numbers<[1], [0], [0], [1], [0, 0, 1, 1], [], []>} : vector<2x32xf32>, vector<32x2xf32>, vector<2x2xf32> -> vector<2x2xf32>
      %cst_23 = arith.constant 0.000000e+00 : f32
      %23 = vector.broadcast %cst_23 : f32 to vector<2x2xf32>
      %24 = arith.maximumf %22, %23 : vector<2x2xf32>
      %cst_24 = arith.constant dense<0.000000e+00> : vector<2x32xf32>
      %25 = tpu.matmul %24, %20, %cst_24 {dimension_numbers = #tpu.dot_dimension_numbers<[1], [0], [0], [1], [0, 0, 1, 1], [], []>} : vector<2x2xf32>, vector<2x32xf32>, vector<2x32xf32> -> vector<2x32xf32>
      %26 = vector.extract_strided_slice %25 {offsets = [0, 0], sizes = [1, 32], strides = [1, 1]} : vector<2x32xf32> to vector<1x32xf32>
      %27 = vector.extract_strided_slice %25 {offsets = [1, 0], sizes = [1, 32], strides = [1, 1]} : vector<2x32xf32> to vector<1x32xf32>
      %28 = arith.addf %26, %27 : vector<1x32xf32>
      %29 = arith.negf %28 : vector<1x32xf32>
      %30 = math.exp %29 : vector<1x32xf32>
      %cst_25 = arith.constant 1.000000e+00 : f32
      %31 = vector.broadcast %cst_25 : f32 to vector<1x32xf32>
      %32 = arith.addf %31, %30 : vector<1x32xf32>
      %33 = arith.divf %31, %32 : vector<1x32xf32>
      %34 = vector.shape_cast %33 : vector<1x32xf32> to vector<1x1x32xf32>
      %c0_26 = arith.constant 0 : index
      %c0_27 = arith.constant 0 : index
      %c0_28 = arith.constant 0 : index
      %35 = vector.load %arg5[%c0_26, %c0_27, %c0_28] : memref<1x1x32xf32, #tpu.memory_space<vmem>>, vector<1x1x32xf32>
      tpu.vector_store %arg5[%c0_26, %c0_27, %c0_28], %34 {strides = array<i32>} : memref<1x1x32xf32, #tpu.memory_space<vmem>>, vector<1x1x32xf32>,
    } else {
    }
    return
  }
  func.func @transform_0(%arg0: i32, %arg1: i32) -> (i32, i32, i32) {
    %c0_i32 = arith.constant 0 : i32
    %c0_i32_0 = arith.constant 0 : i32
    return %arg0, %c0_i32, %arg1 : i32, i32, i32
  }
  func.func @transform_1(%arg0: i32, %arg1: i32) -> (i32, i32) {
    %c0_i32 = arith.constant 0 : i32
    %c0_i32_0 = arith.constant 0 : i32
    %c0_i32_1 = arith.constant 0 : i32
    return %c0_i32, %c0_i32_0 : i32, i32
  }
  func.func @transform_2(%arg0: i32, %arg1: i32) -> (i32, i32) {
    %c0_i32 = arith.constant 0 : i32
    %c0_i32_0 = arith.constant 0 : i32
    %c0_i32_1 = arith.constant 0 : i32
    return %c0_i32, %c0_i32_0 : i32, i32
  }
  func.func @transform_3(%arg0: i32, %arg1: i32) -> (i32, i32, i32) {
    %c0_i32 = arith.constant 0 : i32
    %c0_i32_0 = arith.constant 0 : i32
    %c0_i32_1 = arith.constant 0 : i32
    return %arg0, %c0_i32, %c0_i32_0 : i32, i32, i32
  }
}

</mosaic_0001>

<bundles_post_ra>
// kernel: tpu_custom_call.1
= control target key start
LH: loop header
LB: loop body
LE: loop exit
PB: predicated region body
PF: predicated region fallthrough
CT: control target
= control target key end

     0   :  { %8 = vsyncpa [#allocation5], 0  ;;  %s2017_s0 = inlined_call_operand.hbm [shape: f32[2,32,256], index: 0, kind: input, shape index: {}]   ;;  %s2018_s1 = inlined_call_operand.vmem [shape: f32[32,2], index: 1, kind: input, shape index: {}]   ;;  %s2019_s2 = inlined_call_operand.vmem [shape: f32[2,32], index: 2, kind: input, shape index: {}]   ;;  %s2020_s3 = inlined_call_operand.hbm [shape: f32[2,1,32], index: 3, kind: output, shape index: {}]  }
   0x1   :  { %10 = vsyncpa [#allocation5 + $0x1], 0 }
   0x2   :  { %11 = vsyncpa [#allocation6], 0 }
   0x3   :  { %13 = vsyncpa [#allocation6 + $0x1], 0  ;;  %s1621_s12 = smov 0   ;;  %s1623_s13 = smov 0  }
   0x4   :  { %s1625_s14 = smov 0   ;;  %s1627_s15 = smov 0  }
   0x5   :  { %s1629_s16 = smov 0   ;;  %s1631_s17 = smov 0  }
   0x6   :  { %s1633_s18 = smov 0   ;;  %s1635_s19 = smov 0  }
   0x7   :  { %s1637_s20 = smov 0   ;;  %s1639_s21 = smov 0  }
   0x8   :  { %s1641_s22 = smov 0  }
   0x9 LB: > { %s1269_s23 = sadd.s32 4294967295, %s1587_s22   ;;  %s1270_s24 = sadd.s32 4294967294, %s1587_s22   ;;  %s1587_s22 = sphi %s1641_s22, %s19_s22   ;;  %s1583_s21 = sphi %s1639_s21, %s2044_s21   ;;  %s1579_s20 = sphi %s1637_s20, %s2043_s20   ;;  %s1575_s19 = sphi %s1635_s19, %s2042_s19   ;;  %s1571_s18 = sphi %s1633_s18, %s2041_s18   ;;  %s1567_s17 = sphi %s1631_s17, %s2040_s17   ;;  %s1563_s16 = sphi %s1629_s16, %s2039_s16   ;;  %s1559_s15 = sphi %s1627_s15, %s2038_s15   ;;  %s1555_s14 = sphi %s1625_s14, %s2037_s14   ;;  %s1551_s13 = sphi %s1623_s13, %s2036_s13   ;;  %s1547_s12 = sphi %s1621_s12, %s2035_s12  }
   0xa   : > { %s28_s25 = sadd.s32 1, %s1579_s20  ;;  %s31_s26 = sadd.s32 1, %s1583_s21 }
   0xb   : > { %p29_p0 = scmp.ge.s32.totalorder %s28_s25, 2  ;;  %s40_s27 = sadd.s32 1, %s1567_s17 }
   0xc   : > { %p47_p1 = scmp.ne.s32.totalorder %s1567_s17, %s1563_s16  ;;  %p48_p2 = scmp.eq.s32.totalorder %s1587_s22, 0 }
   0xd   : > { %s2046_s25 = smov (%p29_p0, %s28_s25), 0  ;;  %s2048_s26 = smov (!%p29_p0, %s31_s26), %s1583_s21 }
   0xe   : > { %2024 = sst [smem:[#allocation10_spill]] %s2046_s25  ;;  %s36_s28 = ssub.s32 %s1579_s20, %s2046_s25 }
   0xf   : > { %p1687_p3 = por %p48_p2, %p47_p1  ;;  %p33_p4 = scmp.ge.s32.totalorder %s2048_s26, 2 }
  0x10   : > { %p53_p5 = scmp.ne.s32.totalorder %s1563_s16, %s1559_s15  ;;  %p54_p6 = scmp.eq.s32.totalorder %s1269_s23, 0 }
  0x11   : > { %s108_s30 = sadd.s32 1, %s1555_s14  ;;  %s2050_s26 = smov (%p33_p4, %s2048_s26), 0 }
  0x12   : > { %2026 = sst [smem:[#allocation11_spill]] %s2050_s26  ;;  %p1695_p7 = por %p54_p6, %p53_p5 }
  0x13   : > { %p118_p8 = scmp.ne.s32.totalorder %s1555_s14, %s1551_s13  ;;  %s35_s5 = ssub.s32 %s1583_s21, %s2050_s26 }
  0x14   : > { %p119_p9 = scmp.eq.s32.totalorder %s1269_s23, 3  ;;  %s37_s6 = sor.u32 %s36_s28, %s35_s5 }
  0x15   : > { %p106_p10 = scmp.eq.s32.totalorder %s35_s5, 0  ;;  %p38_p11 = scmp.eq.s32.totalorder %s37_s6, 0 }
  0x16   : > { %p1703_p12 = por %p119_p9, %p118_p8  ;;  %p124_p13 = scmp.ne.s32.totalorder %s1551_s13, %s1547_s12 }
  0x17   : > { %s1708_s8 = scalar_select %p106_p10, %s1555_s14, %s108_s30  }
  0x18   : > { %s2028_s7 = scalar_select %p1703_p12, 1, 0 }
  0x19   : > { %s1711_s9 = scalar_select %p38_p11, %s1567_s17, %s40_s27  }
  0x1a   : > { %p125_p0 = scmp.eq.s32.totalorder %s1270_s24, 3  ;;  %p1329_p1 = scmp.lt.s32.totalorder %s1587_s22, 4 }
  0x1b   : > { %s151_s11 = sand.u32 1, %s1567_s17   ;;  %s1274_s23 = sshll.u32 %s1583_s21, 3 }
  0x1c   : > { %p1716_p2 = por %p125_p0, %p124_p13  ;;  %s1273_s15 = sshll.u32 %s151_s11, 5 }
  0x1d   : > { %s160_s28 = sadd.s32 %s1579_s20, %s1274_s23  ;;  %s155_s5 = scalar_lea.vmem [#allocation4], %s1273_s15 }
  0x1e   : > { %s2029_s10 = scalar_select %p1716_p2, 1, 0 }
  0x1f   : > { %s163_s6 = sshll.u32 %s155_s5, 4  ;;  %s1275_s26 = sshll.u32 %s160_s28, 7  ;;  %s1723_s6 = int_to_ptr.vmem [resolvable:$true] %s163_s6 }
  0x20   : > { %s1728_s27 = scalar_lea.hbm %s2017_s0, %s1275_s26  ;;  %p1732_p4 = pnand %p1329_p1, %p1687_p3 }
  0x21   : > { %s1736_s15 = scalar_lea.sflag [#allocation5], %s151_s11  ;;  %s1435_s23 = scalar_lea.hbm %s1728_s27, 512 }
  0x22   : > { %p1436_p5 = scmp.ne.s32.totalorder %s1728_s27, %s1435_s23  ;;  %p1437_p6 = pneg %p1732_p4 }
  0x23   : > { %s1440_s29 = scalar_lea.hbm %s2017_s0, 2048  ;;  %p1441_p3 = scmp.lt.u32.totalorder %s1728_s27, %s2017_s0 }
  0x24   : > { %p1438_p8 = pnand %p1437_p6, %p1436_p5  ;;  %p1442_p10 = scmp.lt.u32.totalorder %s1440_s29, %s1435_s23 }
  0x25   : > { %p1444_p13 = scmp.lt.u32.totalorder %s1435_s23, %s1728_s27 }
  0x26   : > { %p1439_p9 = pneg %p1438_p8  ;;  %p1443_p11 = por %p1442_p10, %p1441_p3 }
  0x28   : > { %p1445_p0 = por %p1444_p13, %p1443_p11 }
  0x2a   : > { %p1446_p1 = pnand %p1445_p0, %p1439_p9 }
  0x2c   : > { %1449 = shalt.err (!%p1446_p1)
}
  0x2d   : > { %s1450_s11 = scalar_lea.vmem %s1723_s6, 512  ;;  %s1589_s30 = smov [#allocation4]  }
  0x2e   : > { %p1451_p5 = scmp.ne.s32.totalorder %s1723_s6, %s1450_s11  ;;  %s1455_s25 = sshll.u32 %s1589_s30, 4  ;;  %s1456_s25 = int_to_ptr.vmem [resolvable:$false] %s1455_s25 }
  0x2f   : > { %s1457_s26 = scalar_lea.vmem %s1456_s25, 1024  ;;  %p1458_p12 = scmp.lt.s32.totalorder %s1723_s6, %s1456_s25 }
  0x30   : > { %p1453_p8 = pnand %p1451_p5, %p1437_p6  ;;  %p1459_p3 = scmp.lt.s32.totalorder %s1457_s26, %s1450_s11 }
  0x32   : > { %p1454_p2 = pneg %p1453_p8  ;;  %p1460_p10 = por %p1459_p3, %p1458_p12 }
  0x34   : > { %p1461_p11 = pnand %p1460_p10, %p1454_p2 }
  0x36   : > { %1464 = shalt.err (!%p1461_p11)
}
  0x37   : > { %s1590_s23 = smov 256   ;;  %s1591_s29 = smov 128  }
  0x38   : > { %s1592_s28 = smov 8   ;;  %p1276_p6 = scmp.ge.s32.totalorder %s1587_s22, 1 }
  0x39   : > { %1324 = dma.hbm_to_vmem [thread:$0]  (!%p1732_p4), %s1728_s27, 512, %s1723_s6, %s1736_s15, %s1590_s23, %s1591_s29, %s1592_s28  }
  0x3a   : > { %p171_p9 = scmp.lt.s32.totalorder %s1587_s22, 5 }
  0x3c   : > { %p172_p13 = pnand %p1276_p6, %p171_p9 }
  0x3d   : > { %s177_s5 = sand.u32 (!%p172_p13), 1, %s1563_s16  }
  0x3e   : > { %175 = sbr.rel (%p172_p13) target bundleno = 899 (0x383), region = 32  ;;  %s1277_s11 = sshll.u32 (!%p172_p13), %s177_s5, 5 }
  0x3f   : > { %s178_s30 = scalar_lea.sflag (!%p172_p13), [#allocation5], %s177_s5  ;;  %s181_s25 = scalar_lea.vmem (!%p172_p13), [#allocation4], %s1277_s11 }
  0x45   : > { %1538 = dma.done.wait (%p1695_p7), %s178_s30, 512  }
  0x46   : > { %1540 = vsyncadd (%p1695_p7), %s178_s30, 4294966784  ;;  %s201_s26 = sand.u32 1, %s1551_s13   ;;  %p1278_p12 = scmp.ne.s32.totalorder %s1571_s18, 0 }
  0x47   : > { %s1774_s6 = scalar_lea.vmem [#allocation7], %s201_s26  ;;  %vm207_vm0 = vcmask (!%p1278_p12), 253952   ;;  %v1593_v0 = vmov (!%p1278_p12), 0.0   ;;  %v1594_v1 = vmov (!%p1278_p12), -inf  }
  0x48   : > { %206 = sbr.rel (%p1278_p12) target bundleno = 79 (0x4f), region = 40  ;;  %208 = vst.msk [vmem:[#allocation2] sm:$0x1] (!%p1278_p12), %vm207_vm0, %v1593_v0  ;;  %209 = vst.msk [vmem:[#allocation3] sm:$0x1] (!%p1278_p12), %vm207_vm0, %v1594_v1 }
  0x4f PF: > { %v210_v2 = vld [vmem:[%s181_s25] sm:$0xff]  ;;  %v211_v3 = vld [vmem:[%s181_s25 + $0x8] sm:$0xff]  ;;  %v212_v4 = vld [vmem:[%s181_s25 + $0x10] sm:$0xff]  ;;  %v1595_v6 = vmov 0   ;;  %v235_v7 = vlaneseq  ;;  %v1596_v8 = vmov 1966171168  }
  0x50   : > { %214 = vadd.xlane.f32.xlu0 %v210_v2  ;;  %222 = vmax.xlane.f32.xlu1 %v210_v2  ;;  %v213_v5 = vld [vmem:[%s181_s25 + $0x18] sm:$0xff]  ;;  %v368_v9 = vunpack.c.l.s4 %v1596_v8  ;;  %vm582_vm1 = vcmask 130112   ;;  %vm589_vm2 = vcmask 195712   ;;  %vm596_vm3 = vcmask 261312   ;;  %p1279_p7 = scmp.ne.s32.totalorder %s1571_s18, 1 }
  0x51   : > { %1429 = vset.pattern.permute.xlu0 %v1595_v6  ;;  %1430 = vset.pattern.permute.xlu1 %v1595_v6  ;;  %v1778_v10 = vshrl.u32 %v235_v7, 7  ;;  %vm614_vm4 = vcmask 253952   ;;  %vm1598_vm5 = vmmov (!%p1279_p7), 0   ;;  %vm1011_vm6 = vcmask (!%p1279_p7), 1040384  }
  0x52   : > { %v369_v11 = vunpack.c.0.s8 %v368_v9  ;;  %vm1013_vm7 = vcmask (!%p1279_p7), 261120   ;;  %vm1092_vm8 = vcmask (!%p1279_p7), 1041408   ;;  %vm1088_vm9 = vcmask (!%p1279_p7), 15360  }
  0x53   : > { %v1781_v12 = vsub.s32 0, %v1778_v10  ;;  %v1784_v13 = vsub.s32 1, %v1778_v10  ;;  %v1787_v14 = vsub.s32 2, %v1778_v10  ;;  %v1790_v15 = vsub.s32 3, %v1778_v10 }
  0x54   : > { %216 = vadd.xlane.f32.xlu0 %v211_v3  ;;  %224 = vmax.xlane.f32.xlu1 %v211_v3  ;;  %v1793_v16 = vsub.s32 4, %v1778_v10  ;;  %v1796_v17 = vsub.s32 5, %v1778_v10  ;;  %v1799_v18 = vsub.s32 6, %v1778_v10  ;;  %v1802_v19 = vsub.s32 7, %v1778_v10 }
  0x55   : > { %v1805_v22 = vsub.s32 %v369_v11, %v1778_v10 }
  0x58   : > { %218 = vadd.xlane.f32.xlu0 %v212_v4  ;;  %226 = vmax.xlane.f32.xlu1 %v212_v4 }
  0x5c   : > { %220 = vadd.xlane.f32.xlu0 %v213_v5  ;;  %228 = vmax.xlane.f32.xlu1 %v213_v5 }
  0xdd   : > { %v215_v20 = vpop.xlane.xlu0 %214  ;;  %v223_v21 = vpop.xlane.xlu1 %222 }
  0xde   : > { %v238_v23 = vrot.slane %v215_v20, %v1781_v12  ;;  %v242_v24 = vrot.slane %v215_v20, %v1784_v13  ;;  %v246_v25 = vrot.slane %v215_v20, %v1787_v14  ;;  %v250_v26 = vrot.slane %v215_v20, %v1790_v15 }
  0xdf   : > { %v254_v27 = vrot.slane %v215_v20, %v1793_v16  ;;  %v258_v28 = vrot.slane %v215_v20, %v1796_v17  ;;  %v262_v29 = vrot.slane %v215_v20, %v1799_v18  ;;  %v266_v30 = vrot.slane %v215_v20, %v1802_v19 }
  0xe0   : > { %v363_v31 = vcombine.low %v238_v23, %v242_v24  ;;  %v364_v32 = vcombine.low %v246_v25, %v250_v26  ;;  %v624_v33 = vrot.slane %v223_v21, %v1781_v12  ;;  %v628_v34 = vrot.slane %v223_v21, %v1784_v13 }
  0xe1   : > { %v217_v35 = vpop.xlane.xlu0 %216  ;;  %v365_v36 = vcombine.low %v254_v27, %v258_v28  ;;  %v366_v37 = vcombine.low %v262_v29, %v266_v30  ;;  %v632_v38 = vrot.slane %v223_v21, %v1787_v14  ;;  %v636_v39 = vrot.slane %v223_v21, %v1790_v15  ;;  %v225_v60 = vpop.xlane.xlu1 %224 }
  0xe2   : > { %v373_v40 = vrot.slane %v363_v31, %v1805_v22  ;;  %v380_v41 = vrot.slane %v364_v32, %v1805_v22  ;;  %v270_v42 = vrot.slane %v217_v35, %v1781_v12  ;;  %v274_v43 = vrot.slane %v217_v35, %v1784_v13 }
  0xe3   : > { %v387_v44 = vrot.slane %v365_v36, %v1805_v22  ;;  %v394_v45 = vrot.slane %v366_v37, %v1805_v22  ;;  %v278_v46 = vrot.slane %v217_v35, %v1787_v14  ;;  %v282_v47 = vrot.slane %v217_v35, %v1790_v15 }
  0xe4   : > { %v395_v48 = vcombine.low %v373_v40, %v380_v41  ;;  %v286_v49 = vrot.slane %v217_v35, %v1793_v16  ;;  %v290_v50 = vrot.slane %v217_v35, %v1796_v17  ;;  %v294_v51 = vrot.slane %v217_v35, %v1799_v18 }
  0xe5   : > { %v396_v52 = vcombine.low %v387_v44, %v394_v45  ;;  %v298_v53 = vrot.slane %v217_v35, %v1802_v19  ;;  %v412_v54 = vcombine.low %v270_v42, %v274_v43  ;;  %v413_v55 = vcombine.low %v278_v46, %v282_v47  ;;  %v219_v32 = vpop.xlane.xlu0 %218 }
  0xe6   : > { %v403_v56 = vrot.slane %v395_v48, %v1805_v22  ;;  %v414_v57 = vcombine.low %v286_v49, %v290_v50  ;;  %v640_v58 = vrot.slane %v223_v21, %v1793_v16  ;;  %v644_v59 = vrot.slane %v223_v21, %v1796_v17  ;;  %v227_v49 = vpop.xlane.xlu1 %226 }
  0xe7   : > { %v410_v61 = vrot.slane %v396_v52, %v1805_v22  ;;  %v415_v62 = vcombine.low %v294_v51, %v298_v53  ;;  %v422_v63 = vrot.slane %v412_v54, %v1805_v22  ;;  %v429_v0 = vrot.slane %v413_v55, %v1805_v22 }
  0xe8   : > { %v436_v1 = vrot.slane %v414_v57, %v1805_v22  ;;  %v648_v2 = vrot.slane %v223_v21, %v1799_v18  ;;  %v652_v3 = vrot.slane %v223_v21, %v1802_v19  ;;  %v749_v4 = vcombine.low %v624_v33, %v628_v34 }
  0xe9   : > { %v411_v5 = vcombine.low %v403_v56, %v410_v61  ;;  %v443_v6 = vrot.slane %v415_v62, %v1805_v22  ;;  %v444_v8 = vcombine.low %v422_v63, %v429_v0  ;;  %v750_v9 = vcombine.low %v632_v38, %v636_v39 }
  0xea   : > { %v751_v11 = vcombine.low %v640_v58, %v644_v59  ;;  %v752_v20 = vcombine.low %v648_v2, %v652_v3  ;;  %v759_v23 = vrot.slane %v749_v4, %v1805_v22  ;;  %v656_v24 = vrot.slane %v225_v60, %v1781_v12 }
  0xeb   : > { %560 = vperm.xlu0 %1429, %v411_v5   ;;  %v445_v25 = vcombine.low %v436_v1, %v443_v6  ;;  %v452_v26 = vrot.slane %v444_v8, %v1805_v22  ;;  %v766_v27 = vrot.slane %v750_v9, %v1805_v22  ;;  %v660_v21 = vrot.slane %v225_v60, %v1784_v13 }
  0xec   : > { %v773_v28 = vrot.slane %v751_v11, %v1805_v22  ;;  %v780_v29 = vrot.slane %v752_v20, %v1805_v22  ;;  %v664_v30 = vrot.slane %v225_v60, %v1787_v14  ;;  %v668_v31 = vrot.slane %v225_v60, %v1790_v15  ;;  %v221_v20 = vpop.xlane.xlu0 %220 }
  0xed   : > { %v459_v33 = vrot.slane %v445_v25, %v1805_v22  ;;  %v781_v34 = vcombine.low %v759_v23, %v766_v27  ;;  %v672_v35 = vrot.slane %v225_v60, %v1793_v16  ;;  %v676_v36 = vrot.slane %v225_v60, %v1796_v17 }
  0xee   : > { %v782_v37 = vcombine.low %v773_v28, %v780_v29  ;;  %v680_v38 = vrot.slane %v225_v60, %v1799_v18  ;;  %v684_v39 = vrot.slane %v225_v60, %v1802_v19  ;;  %v798_v40 = vcombine.low %v656_v24, %v660_v21 }
  0xef   : > { %v460_v41 = vcombine.low %v452_v26, %v459_v33  ;;  %v789_v42 = vrot.slane %v781_v34, %v1805_v22  ;;  %v799_v43 = vcombine.low %v664_v30, %v668_v31  ;;  %v800_v44 = vcombine.low %v672_v35, %v676_v36 }
  0xf0   : > { %v796_v45 = vrot.slane %v782_v37, %v1805_v22  ;;  %v801_v46 = vcombine.low %v680_v38, %v684_v39  ;;  %v808_v47 = vrot.slane %v798_v40, %v1805_v22  ;;  %v302_v48 = vrot.slane %v219_v32, %v1781_v12 }
  0xf1   : > { %563 = vperm.xlu1 %1430, %v460_v41   ;;  %v815_v50 = vrot.slane %v799_v43, %v1805_v22  ;;  %v822_v51 = vrot.slane %v800_v44, %v1805_v22  ;;  %v306_v52 = vrot.slane %v219_v32, %v1784_v13  ;;  %v310_v53 = vrot.slane %v219_v32, %v1787_v14 }
  0xf2   : > { %v797_v54 = vcombine.low %v789_v42, %v796_v45  ;;  %v829_v55 = vrot.slane %v801_v46, %v1805_v22  ;;  %v314_v56 = vrot.slane %v219_v32, %v1790_v15  ;;  %v318_v57 = vrot.slane %v219_v32, %v1793_v16  ;;  %v229_v42 = vpop.xlane.xlu1 %228 }
  0xf3   : > { %v830_v58 = vcombine.low %v808_v47, %v815_v50  ;;  %v322_v59 = vrot.slane %v219_v32, %v1796_v17  ;;  %v326_v60 = vrot.slane %v219_v32, %v1799_v18  ;;  %v330_v61 = vrot.slane %v219_v32, %v1802_v19 }
  0xf4   : > { %v831_v62 = vcombine.low %v822_v51, %v829_v55  ;;  %v461_v63 = vcombine.low %v302_v48, %v306_v52  ;;  %v462_v0 = vcombine.low %v310_v53, %v314_v56  ;;  %v688_v1 = vrot.slane %v227_v49, %v1781_v12 }
  0xf5   : > { %946 = vperm.xlu1 %1430, %v797_v54   ;;  %v838_v2 = vrot.slane %v830_v58, %v1805_v22  ;;  %v463_v3 = vcombine.low %v318_v57, %v322_v59  ;;  %v464_v4 = vcombine.low %v326_v60, %v330_v61  ;;  %v692_v5 = vrot.slane %v227_v49, %v1784_v13 }
  0xf6   : > { %v845_v6 = vrot.slane %v831_v62, %v1805_v22  ;;  %v471_v8 = vrot.slane %v461_v63, %v1805_v22  ;;  %v478_v9 = vrot.slane %v462_v0, %v1805_v22  ;;  %v696_v11 = vrot.slane %v227_v49, %v1787_v14 }
  0xf7   : > { %v485_v23 = vrot.slane %v463_v3, %v1805_v22  ;;  %v492_v24 = vrot.slane %v464_v4, %v1805_v22  ;;  %v700_v25 = vrot.slane %v227_v49, %v1790_v15  ;;  %v704_v26 = vrot.slane %v227_v49, %v1793_v16 }
  0xf8   : > { %v846_v27 = vcombine.low %v838_v2, %v845_v6  ;;  %v493_v21 = vcombine.low %v471_v8, %v478_v9  ;;  %v708_v28 = vrot.slane %v227_v49, %v1796_v17  ;;  %v712_v29 = vrot.slane %v227_v49, %v1799_v18 }
  0xf9   : > { %v494_v30 = vcombine.low %v485_v23, %v492_v24  ;;  %v716_v31 = vrot.slane %v227_v49, %v1802_v19  ;;  %v847_v32 = vcombine.low %v688_v1, %v692_v5  ;;  %v848_v33 = vcombine.low %v696_v11, %v700_v25 }
  0xfa   : > { %949 = vperm.xlu1 %1430, %v846_v27   ;;  %v501_v34 = vrot.slane %v493_v21, %v1805_v22  ;;  %v849_v35 = vcombine.low %v704_v26, %v708_v28  ;;  %v334_v36 = vrot.slane %v221_v20, %v1781_v12  ;;  %v338_v37 = vrot.slane %v221_v20, %v1784_v13 }
  0xfb   : > { %v508_v38 = vrot.slane %v494_v30, %v1805_v22  ;;  %v850_v39 = vcombine.low %v712_v29, %v716_v31  ;;  %v857_v40 = vrot.slane %v847_v32, %v1805_v22  ;;  %v864_v41 = vrot.slane %v848_v33, %v1805_v22 }
  0xfc   : > { %v871_v43 = vrot.slane %v849_v35, %v1805_v22  ;;  %v342_v44 = vrot.slane %v221_v20, %v1787_v14  ;;  %v346_v45 = vrot.slane %v221_v20, %v1790_v15  ;;  %v350_v46 = vrot.slane %v221_v20, %v1793_v16 }
  0xfd   : > { %v509_v47 = vcombine.low %v501_v34, %v508_v38  ;;  %v878_v48 = vrot.slane %v850_v39, %v1805_v22  ;;  %v879_v49 = vcombine.low %v857_v40, %v864_v41  ;;  %v354_v50 = vrot.slane %v221_v20, %v1796_v17 }
  0xfe   : > { %v358_v51 = vrot.slane %v221_v20, %v1799_v18  ;;  %v362_v52 = vrot.slane %v221_v20, %v1802_v19  ;;  %v510_v53 = vcombine.low %v334_v36, %v338_v37  ;;  %v511_v54 = vcombine.low %v342_v44, %v346_v45 }
  0xff   : > { %566 = vperm.xlu1 %1430, %v509_v47   ;;  %v880_v55 = vcombine.low %v871_v43, %v878_v48  ;;  %v887_v56 = vrot.slane %v879_v49, %v1805_v22  ;;  %v512_v57 = vcombine.low %v350_v46, %v354_v50  ;;  %v720_v58 = vrot.slane %v229_v42, %v1781_v12 }
 0x100   : > { %v513_v59 = vcombine.low %v358_v51, %v362_v52  ;;  %v520_v60 = vrot.slane %v510_v53, %v1805_v22  ;;  %v527_v61 = vrot.slane %v511_v54, %v1805_v22  ;;  %v724_v62 = vrot.slane %v229_v42, %v1784_v13 }
 0x101   : > { %v894_v63 = vrot.slane %v880_v55, %v1805_v22  ;;  %v534_v0 = vrot.slane %v512_v57, %v1805_v22  ;;  %v728_v1 = vrot.slane %v229_v42, %v1787_v14  ;;  %v732_v2 = vrot.slane %v229_v42, %v1790_v15  ;;  %v230_v55 = vld [vmem:[#allocation2] sm:$0x1] }
 0x102   : > { %v541_v3 = vrot.slane %v513_v59, %v1805_v22  ;;  %v542_v4 = vcombine.low %v520_v60, %v527_v61  ;;  %v736_v12 = vrot.slane %v229_v42, %v1793_v16  ;;  %v740_v5 = vrot.slane %v229_v42, %v1796_v17 }
 0x103   : > { %v895_v6 = vcombine.low %v887_v56, %v894_v63  ;;  %v744_v8 = vrot.slane %v229_v42, %v1799_v18  ;;  %v748_v13 = vrot.slane %v229_v42, %v1802_v19  ;;  %v896_v9 = vcombine.low %v720_v58, %v724_v62  ;;  %v616_v63 = vld [vmem:[#allocation3] sm:$0x1] }
 0x104   : > { %v543_v11 = vcombine.low %v534_v0, %v541_v3  ;;  %v550_v20 = vrot.slane %v542_v4, %v1805_v22  ;;  %v897_v23 = vcombine.low %v728_v1, %v732_v2  ;;  %v898_v14 = vcombine.low %v736_v12, %v740_v5  ;;  %v1000_v2 = vld [vmem:[%s2018_s1] sm:$0xff] (!%p1279_p7)  ;;  %v1001_v3 = vld [vmem:[%s2018_s1 + $0x8] sm:$0xff] (!%p1279_p7)  ;;  %v1002_v4 = vld [vmem:[%s2018_s1 + $0x10] sm:$0xff] (!%p1279_p7) }
 0x105   : > { %952 = vperm.xlu1 %1430, %v895_v6   ;;  %v899_v15 = vcombine.low %v744_v8, %v748_v13  ;;  %v906_v24 = vrot.slane %v896_v9, %v1805_v22  ;;  %v572_v33 = vand.u32 127, %v235_v7  ;;  %v1597_v12 = vmov (!%p1279_p7), 0.0|0.0   ;;  %v1003_v5 = vld [vmem:[%s2018_s1 + $0x18] sm:$0xff] (!%p1279_p7) }
 0x106   : > { %v557_v25 = vrot.slane %v543_v11, %v1805_v22  ;;  %v913_v16 = vrot.slane %v897_v23, %v1805_v22  ;;  %v920_v17 = vrot.slane %v898_v14, %v1805_v22  ;;  %1311 = vmatprep.subr.bf16.mxu0 (!%p1279_p7), %v1597_v12  ;;  %v1599_v6 = vmov (!%p1279_p7), 0.0   ;;  %v1004_v23 = vld [vmem:[%s2019_s2] sm:$0x3] (!%p1279_p7) }
 0x107   : > { %v927_v18 = vrot.slane %v899_v15, %v1805_v22  ;;  %v577_v34 = vadd.s32 4294967288, %v572_v33  ;;  %v584_v36 = vadd.s32 4294967280, %v572_v33  ;;  %v591_v38 = vadd.s32 4294967272, %v572_v33  ;;  %1303 = vmatprep.mubr.msk.f32.mxu0 (!%p1279_p7), %vm1598_vm5, %v1599_v6  ;;  %1306 = vmatprep.subr.mxu1 (!%p1279_p7), %v1599_v6 }
 0x108   : > { %v558_v26 = vcombine.low %v550_v20, %v557_v25  ;;  %v928_v19 = vcombine.low %v906_v24, %v913_v16  ;;  %v575_v40 = vsub.s32 %v572_v33, %v1778_v10  ;;  %1308 = vmatprep.mubr.msk.f32.mxu1 (!%p1279_p7), %vm1598_vm5, %v1599_v6  ;;  %v1315_v13 = vpack.c.bf16 (!%p1279_p7), %v1003_v5, %v1002_v4 }
 0x109   : > { %v929_v27 = vcombine.low %v920_v17, %v927_v18  ;;  %v580_v37 = vsub.s32 %v577_v34, %v1778_v10  ;;  %v587_v39 = vsub.s32 %v584_v36, %v1778_v10  ;;  %v594_v44 = vsub.s32 %v591_v38, %v1778_v10  ;;  %1307 = vmatpush3.msk.msra.mxu1 (!%p1279_p7), %vm1092_vm8, %v1004_v23 }
 0x10a   : > { %569 = vperm.xlu1 %1430, %v558_v26   ;;  %v936_v21 = vrot.slane %v928_v19, %v1805_v22 }
 0x10b   : > { %v943_v28 = vrot.slane %v929_v27, %v1805_v22 }
 0x10d   : > { %v944_v29 = vcombine.low %v936_v21, %v943_v28 }
 0x10f   : > { %955 = vperm.xlu1 %1430, %v944_v29  }
 0x16a   : > { %v561_v42 = vpop.permute.xlu0 %560 }
 0x16b   : > { %v576_v46 = vrot.slane %v561_v42, %v575_v40 }
 0x170   : > { %v564_v30 = vpop.permute.xlu1 %563 }
 0x171   : > { %v581_v43 = vrot.slane %v564_v30, %v580_v37 }
 0x173   : > { %v583_v47 = vsel %vm582_vm1, %v581_v43, %v576_v46 }
 0x174   : > { %v947_v31 = vpop.permute.xlu1 %946 }
 0x175   : > { %v960_v53 = vrot.slane %v947_v31, %v575_v40 }
 0x179   : > { %v950_v32 = vpop.permute.xlu1 %949 }
 0x17a   : > { %v964_v49 = vrot.slane %v950_v32, %v580_v37 }
 0x17c   : > { %v965_v56 = vsel %vm582_vm1, %v964_v49, %v960_v53 }
 0x17e   : > { %v567_v35 = vpop.permute.xlu1 %566 }
 0x17f   : > { %v588_v45 = vrot.slane %v567_v35, %v587_v39 }
 0x181   : > { %v590_v50 = vsel %vm589_vm2, %v588_v45, %v583_v47 }
 0x184   : > { %v953_v41 = vpop.permute.xlu1 %952 }
 0x185   : > { %v969_v51 = vrot.slane %v953_v41, %v587_v39 }
 0x187   : > { %v970_v59 = vsel %vm589_vm2, %v969_v51, %v965_v56 }
 0x189   : > { %v570_v7 = vpop.permute.xlu1 %569 }
 0x18a   : > { %v595_v48 = vrot.slane %v570_v7, %v594_v44 }
 0x18c   : > { %v597_v52 = vsel %vm596_vm3, %v595_v48, %v590_v50 }
 0x18d   : > { %v604_v54 = vrot.slane %v597_v52, %v1805_v22 }
 0x18e   : > { %v956_v10 = vpop.permute.xlu1 %955 }
 0x18f   : > { %v611_v57 = vrot.slane %v604_v54, %v1805_v22  ;;  %v974_v58 = vrot.slane %v956_v10, %v594_v44 }
 0x191   : > { %v613_v60 = vadd.f32 %v611_v57, %v230_v55  ;;  %v975_v61 = vsel %vm596_vm3, %v974_v58, %v970_v59 }
 0x192   : > { %v982_v62 = vrot.slane %v975_v61, %v1805_v22  ;;  %996 = sbr.rel (%p1279_p7) target bundleno = 874 (0x36a), region = 44 }
 0x193   : > { %615 = vst.msk [vmem:[#allocation2] sm:$0x1] %vm614_vm4, %v613_v60 }
 0x194   : > { %v989_v0 = vrot.slane %v982_v62, %v1805_v22  ;;  %v1312_v22 = vpack.c.bf16 (!%p1279_p7), %v1001_v3, %v1000_v2 }
 0x196   : > { %v991_v1 = vmax.f32 %v616_v63, %v989_v0  ;;  %1313 = vmatpush3.bf16.msra.mxu0 (!%p1279_p7), %v1312_v22 }
 0x197   : > { %1314 = vmatprep.subr.bf16.mxu0 (!%p1279_p7), %v1597_v12 }
 0x198   : > { %992 = vst.msk [vmem:[#allocation3] sm:$0x1] %vm614_vm4, %v991_v1 }
 0x19a   : > { %v997_v8 = vld [vmem:[#allocation2] sm:$0x1]  ;;  %1316 = vmatpush3.bf16.msra.mxu0 %v1315_v13 }
 0x19b   : > { %v998_v9 = vmul.f32 0.00390625, %v997_v8 }
 0x19f   : > { %v1280_v11 = vld [vmem:[#allocation3] ss:$0 sm:$0xff] }
 0x1a0   : > { %v1012_v20 = vsel %vm1011_vm6, %v998_v9, %v1280_v11 }
 0x1a1   : > { %1304 = vmatmul.mubr.msk.f32.vlgmr.msra.gmra.mrb[0].mxu0 %vm1013_vm7, %v1012_v20 }
 0x274   : > { %v1083_v14 = vpop.f32.mrb[0].mxu0 }
 0x275   : > { %v1087_v15 = vmax.f32 %v1083_v14, 0.0  ;;  %v1305_v24 = vpop.f32.mrb[1].mxu0 }
 0x277   : > { %1309 = vmatmul.mubr.msk.f32.vlgmr.msra.gmra.mrb[0].mxu1 %vm1088_vm9, %v1087_v15 }
 0x34a   : > { %v1162_v25 = vpop.f32.mrb[0].mxu1 }
 0x34b   : > { %v1167_v16 = vrot.slane %v1162_v25, 1  ;;  %v1310_v17 = vpop.f32.mrb[1].mxu1 }
 0x34d   : > { %v1169_v18 = vadd.f32 %v1167_v16, %v1162_v25 }
 0x34f   : > { %v1284_v26 = vmul.f32 -1.442695, %v1169_v18 }
 0x351   : > { %1431 = vpow2.f32 %v1284_v26 }
 0x35b   : > { %v1432_v19 = vpop.eup %1431 }
 0x35c   : > { %v1173_v27 = vadd.f32 1.0, %v1432_v19 }
 0x35e   : > { %1433 = vrcp.f32 %v1173_v27 }
 0x368   : > { %v1434_v21 = vpop.eup %1433 }
 0x369   : > { %1176 = vst.msk [vmem:[%s1774_s6] sm:$0x1] %vm614_vm4, %v1434_v21 }
 0x36a PF: > { %s1285_s30 = sshll.u32 %s1575_s19, 4  ;;  %s1190_s24 = sshll.u32 %s1774_s6, 4  ;;  %s1191_s24 = int_to_ptr.vmem [resolvable:$true] %s1190_s24 }
 0x36b   : > { %s1958_s27 = scalar_lea.hbm %s2020_s3, %s1285_s30  ;;  %s1178_s15 = scalar_lea.sflag [#allocation6], %s201_s26 }
 0x36c   : > { %s1465_s23 = scalar_lea.vmem %s1191_s24, 16  ;;  %p2031_p4 = scmp.ne.s32.totalorder %s2028_s7, 0 }
 0x36d   : > { %p1466_p2 = scmp.ne.s32.totalorder %s1191_s24, %s1465_s23  ;;  %s1600_s29 = smov [#allocation7]  }
 0x36e   : > { %s1469_s28 = sshll.u32 %s1600_s29, 4  ;;  %s1470_s28 = int_to_ptr.vmem [resolvable:$false] %s1469_s28 }
 0x36f   : > { %p1467_p0 = pnand %p1466_p2, %p2031_p4  ;;  %s1471_s5 = scalar_lea.vmem %s1470_s28, 32 }
 0x370   : > { %p1472_p5 = scmp.lt.s32.totalorder %s1191_s24, %s1470_s28  ;;  %p1473_p8 = scmp.lt.s32.totalorder %s1471_s5, %s1465_s23 }
 0x371   : > { %p1468_p1 = pneg %p1467_p0 }
 0x372   : > { %p1474_p3 = por %p1473_p8, %p1472_p5 }
 0x374   : > { %p1475_p10 = pnand %p1474_p3, %p1468_p1 }
 0x376   : > { %1478 = shalt.err (!%p1475_p10)
}
 0x377   : > { %s1479_s19 = scalar_lea.hbm %s1958_s27, 16  ;;  %s1483_s18 = scalar_lea.hbm %s2020_s3, 32 }
 0x378   : > { %p1480_p11 = scmp.ne.s32.totalorder %s1958_s27, %s1479_s19  ;;  %p1484_p13 = scmp.lt.u32.totalorder %s1958_s27, %s2020_s3 }
 0x379   : > { %p1485_p12 = scmp.lt.u32.totalorder %s1483_s18, %s1479_s19  ;;  %p1487_p2 = scmp.lt.u32.totalorder %s1479_s19, %s1958_s27 }
 0x37a   : > { %p1481_p6 = pnand %p1480_p11, %p2031_p4 }
 0x37b   : > { %p1486_p7 = por %p1485_p12, %p1484_p13 }
 0x37c   : > { %p1482_p9 = pneg %p1481_p6 }
 0x37d   : > { %p1488_p0 = por %p1487_p2, %p1486_p7 }
 0x37f   : > { %p1489_p1 = pnand %p1488_p0, %p1482_p9 }
 0x381   : > { %1492 = shalt.err (!%p1489_p1)
}
 0x382   : > { %1319 = dma.vmem_to_hbm [thread:$0]  (%p2031_p4), %s1191_s24, 16, %s1958_s27, %s1178_s15  }
 0x383 PF: > { %p1330_p5 = scmp.ge.s32.totalorder %s1587_s22, 2  ;;  %s1202_s25 = sand.u32 1, %s1547_s12  }
 0x384   : > { %p2032_p8 = scmp.ne.s32.totalorder %s2029_s10, 0  ;;  %s1203_s4 = scalar_lea.sflag [#allocation6], %s1202_s25 }
 0x386   : > { %p1326_p3 = pnand %p1330_p5, %p2032_p8 }
 0x388   : > { %1542 = dma.done.wait (!%p1326_p3), %s1203_s4, 16  }
 0x389   : > { %1544 = vsyncadd (!%p1326_p3), %s1203_s4, 4294967280  ;;  %s19_s22 = sadd.s32 1, %s1587_s22   ;;  %s2033_s7 = sld [smem:[#allocation10_spill]] }
 0x38a   : > { %p16_p10 = scmp.ge.s32.totalorder %s19_s22, 6   ;;  %s2034_s27 = sld [smem:[#allocation11_spill]] }
 0x38b   : > { %s2035_s12 = smov %s1551_s13  ;;  %s2036_s13 = smov %s1555_s14 }
 0x38c   : > { %s2037_s14 = smov %s1708_s8  ;;  %s2038_s15 = smov %s1563_s16 }
 0x38d   : > { %s2039_s16 = smov %s1567_s17  ;;  %s2040_s17 = smov %s1711_s9 }
 0x38e   : > { %s2041_s18 = smov %s1579_s20  ;;  %s2042_s19 = smov %s1583_s21 }
 0x38f   : > { %s2043_s20 = smov %s2033_s7  ;;  %18 = sbr.rel (!%p16_p10) target bundleno = 9 (0x9), region = 85 }
 0x390   : > { %s2044_s21 = smov %s2034_s27 }
 0x396   :  { %1207 = vsyncpa [#allocation5], 1 }
 0x397   :  { %1209 = vsyncpa [#allocation5 + $0x1], 1 }
 0x398   :  { %1210 = vsyncpa [#allocation6], 1 }
 0x399   :  { %1212 = vsyncpa [#allocation6 + $0x1], 1 }

</bundles_post_ra>
